<compile_context>
chip_gen: v6e
topology: v6e:2x2x1
jax: 0.10.0
libtpu: 0.0.40
codegen_flags: <defaults>
</compile_context>

<pallas_src>
import numpy as np
import jax
import jax.numpy as jnp
from jax import lax
from jax.experimental import pallas as pl
from jax.experimental.pallas import tpu as pltpu

SUBLANE = 8


def _round_up(x, m):
    return (x + m - 1) // m * m


# ---------------------------------------------------------------------------
# Pallas kernel:
#   x_all   = onehot(tok) @ table                 (table = emb @ W_ih + b_ih + b_hh)
#   h_t     = tanh(x_t + h_{t-1} @ W_hh)          (fully unrolled, static T)
#   logits_t = h_t @ W_fc + b_fc                  (interleaved per step: one full
#                                                  unmasked (8,128) store each)
# ---------------------------------------------------------------------------
def decoder_rnn_kernel(tok_ref, table_ref, h0_ref, whh_ref, wfc_ref, bfc_ref,
                       logits_ref, hout_ref):
    TB = tok_ref.shape[0]          # T * B_pad
    V = table_ref.shape[0]
    B_pad = h0_ref.shape[0]
    T = TB // B_pad

    # --- fused embedding + input projection via one-hot matmul (off the serial chain) ---
    # NOTE: at V=128 the one-hot path is cheap; if V grows past ~512 switch to
    # scalar-prefetched tokens in SMEM + dynamic-row reads of the fused table.
    tok = tok_ref[...]                                              # (T*B_pad, 1) int32, time-major
    vocab_iota = lax.broadcasted_iota(jnp.int32, (TB, V), 1)
    onehot = (tok == vocab_iota).astype(jnp.float32)                # (T*B_pad, V)
    x_all = jnp.dot(onehot, table_ref[...],
                    preferred_element_type=jnp.float32)             # (T*B_pad, H)

    # --- hoisted loop invariants ---
    whh = whh_ref[...]                                              # (H, H)
    wfc = wfc_ref[...]                                              # (H, V)
    bfc = jnp.broadcast_to(bfc_ref[...], (B_pad, V))                # hoisted broadcast

    # --- serial recurrence, fully unrolled; fc projection interleaved as filler ---
    h = h0_ref[...]                                                 # (B_pad, H)
    for t in range(T):                                              # static T -> full unroll
        x_t = x_all[t * B_pad:(t + 1) * B_pad, :]                   # static sublane-aligned slice
        h = jnp.tanh(x_t + jnp.dot(h, whh, preferred_element_type=jnp.float32))
        # one (8,32)@(32,128) matmul + one full unmasked (8,128) store per step
        logits_ref[t] = jnp.dot(h, wfc, preferred_element_type=jnp.float32) + bfc
    hout_ref[...] = h


# ---------------------------------------------------------------------------
# Wrapper (glue): table fusion, batch padding, time-major token column,
# pallas_call, un-pad / back to batch_first.
# ---------------------------------------------------------------------------
def decoder_forward(tokens, hidden, params):
    emb_table = params["embedding"]   # (V, E)
    wih = params["w_ih"]              # (E, H)
    whh = params["w_hh"]              # (H, H)
    wfc = params["w_fc"]              # (H, V)
    bfc = params["b_fc"]              # (1, V)

    # Fused (V, H) lookup table: onehot @ table == emb_row @ W_ih + (b_ih + b_hh).
    # Exact because each one-hot row has a single 1.
    table = emb_table @ wih + (params["b_ih"] + params["b_hh"])

    B, T = tokens.shape
    V = emb_table.shape[0]
    H = wih.shape[1]
    B_pad = _round_up(max(B, SUBLANE), SUBLANE)

    # glue: pad batch to the sublane quantum; tokens -> time-major column (T*B_pad, 1)
    tok_p = jnp.zeros((B_pad, T), jnp.int32).at[:B].set(tokens.astype(jnp.int32))
    tok_tm = jnp.transpose(tok_p, (1, 0)).reshape(T * B_pad, 1)
    h0 = jnp.zeros((B_pad, H), jnp.float32).at[:B].set(hidden[0])

    vmem = pl.BlockSpec(memory_space=pltpu.MemorySpace.VMEM)
    logits_tm, h_final = pl.pallas_call(
        decoder_rnn_kernel,
        out_shape=(jax.ShapeDtypeStruct((T, B_pad, V), jnp.float32),
                   jax.ShapeDtypeStruct((B_pad, H), jnp.float32)),
        in_specs=[vmem] * 6,
        out_specs=(vmem, vmem),
    )(tok_tm, table, h0, whh, wfc, bfc)

    # un-pad + back to batch_first layout: (T, B_pad, V) -> (B, T, V)
    logits = jnp.transpose(logits_tm[:, :B, :], (1, 0, 2))
    return logits, h_final[:B][None]                                # (1, B, H)


# ---------------------------------------------------------------------------
# Pure-JAX reference (mirrors torch.nn.Embedding + nn.RNN(tanh) + nn.Linear)
# ---------------------------------------------------------------------------
def decoder_reference(tokens, hidden, params):
    emb = jnp.take(params["embedding"], tokens, axis=0)  # (B, T, E)
    h = hidden[0]
    outs = []
    for t in range(tokens.shape[1]):
        h = jnp.tanh(emb[:, t, :] @ params["w_ih"] + params["b_ih"]
                     + h @ params["w_hh"] + params["b_hh"])
        outs.append(h @ params["w_fc"] + params["b_fc"])
    logits = jnp.stack(outs, axis=1)
    return logits, h[None]


def init_params(key, vocab, emb_size, hidden):
    ks = jax.random.split(key, 7)
    k_rnn = 1.0 / np.sqrt(hidden)
    k_fc = 1.0 / np.sqrt(hidden)
    return {
        "embedding": jax.random.normal(ks[0], (vocab, emb_size), jnp.float32),
        "w_ih": jax.random.uniform(ks[1], (emb_size, hidden), jnp.float32, -k_rnn, k_rnn),
        "b_ih": jax.random.uniform(ks[2], (1, hidden), jnp.float32, -k_rnn, k_rnn),
        "w_hh": jax.random.uniform(ks[3], (hidden, hidden), jnp.float32, -k_rnn, k_rnn),
        "b_hh": jax.random.uniform(ks[4], (1, hidden), jnp.float32, -k_rnn, k_rnn),
        "w_fc": jax.random.uniform(ks[5], (hidden, vocab), jnp.float32, -k_fc, k_fc),
        "b_fc": jax.random.uniform(ks[6], (1, vocab), jnp.float32, -k_fc, k_fc),
    }


if __name__ == "__main__":
    # Config: cell_type='rnn', decoder_layers=1, dropout=0 (inactive in eval anyway).
    # TODO(synk): GRU/LSTM cell variants and multi-layer stacking are not implemented.
    VOCAB = 128        # output_vocab_size (multiple of 128 -> unmasked lane-dense stores)
    EMB = 32           # embedding_size
    HIDDEN = 32        # hidden_size
    B, T = 2, 8        # batch, sequence length

    key = jax.random.PRNGKey(0)
    k_par, k_tok, k_hid = jax.random.split(key, 3)

    params = init_params(k_par, VOCAB, EMB, HIDDEN)
    tokens = jax.random.randint(k_tok, (B, T), 0, VOCAB, dtype=jnp.int32)
    hidden0 = jax.random.normal(k_hid, (1, B, HIDDEN), jnp.float32)

    logits, h_final = jax.jit(decoder_forward)(tokens, hidden0, params)
    jax.block_until_ready((logits, h_final))

    ref_logits, ref_h = decoder_reference(tokens, hidden0, params)
    np.testing.assert_allclose(np.asarray(logits), np.asarray(ref_logits),
                               rtol=1e-5, atol=1e-5)
    np.testing.assert_allclose(np.asarray(h_final), np.asarray(ref_h),
                               rtol=1e-5, atol=1e-5)

    assert logits.shape == (B, T, VOCAB)
    assert h_final.shape == (1, B, HIDDEN)
    print("KERNEL_OK")
</pallas_src>

<mosaic_0001>
module attributes {stable_mosaic.version = 11 : i64} {
  func.func @decoder_rnn_kernel(%arg0: memref<64x1xi32, #tpu.memory_space<vmem>>, %arg1: memref<128x32xf32, #tpu.memory_space<vmem>>, %arg2: memref<8x32xf32, #tpu.memory_space<vmem>>, %arg3: memref<32x32xf32, #tpu.memory_space<vmem>>, %arg4: memref<32x128xf32, #tpu.memory_space<vmem>>, %arg5: memref<1x128xf32, #tpu.memory_space<vmem>>, %arg6: memref<8x8x128xf32, #tpu.memory_space<vmem>>, %arg7: memref<8x32xf32, #tpu.memory_space<vmem>>) attributes {dimension_semantics = [], scalar_prefetch = 0 : i64, scratch_operands = 0 : i64, tpu.core_type = #tpu.core_type<tc>} {
    %c0 = arith.constant 0 : index
    %c0_0 = arith.constant 0 : index
    %0 = vector.load %arg0[%c0, %c0_0] : memref<64x1xi32, #tpu.memory_space<vmem>>, vector<64x1xi32>
    %1 = tpu.iota {dimensions = array<i32: 1>} : vector<64x128xi32>
    %2 = vector.broadcast %0 : vector<64x1xi32> to vector<64x128xi32>
    %3 = arith.cmpi eq, %2, %1 : vector<64x128xi32>
    %4 = arith.extui %3 : vector<64x128xi1> to vector<64x128xi32>
    %5 = arith.sitofp %4 : vector<64x128xi32> to vector<64x128xf32>
    %c0_1 = arith.constant 0 : index
    %c0_2 = arith.constant 0 : index
    %6 = vector.load %arg1[%c0_1, %c0_2] : memref<128x32xf32, #tpu.memory_space<vmem>>, vector<128x32xf32>
    %cst = arith.constant dense<0.000000e+00> : vector<64x32xf32>
    %7 = tpu.matmul %5, %6, %cst {dimension_numbers = #tpu.dot_dimension_numbers<[1], [0], [0], [1], [0, 0, 1, 1], [], []>} : vector<64x128xf32>, vector<128x32xf32>, vector<64x32xf32> -> vector<64x32xf32>
    %c0_3 = arith.constant 0 : index
    %c0_4 = arith.constant 0 : index
    %8 = vector.load %arg3[%c0_3, %c0_4] : memref<32x32xf32, #tpu.memory_space<vmem>>, vector<32x32xf32>
    %c0_5 = arith.constant 0 : index
    %c0_6 = arith.constant 0 : index
    %9 = vector.load %arg4[%c0_5, %c0_6] : memref<32x128xf32, #tpu.memory_space<vmem>>, vector<32x128xf32>
    %c0_7 = arith.constant 0 : index
    %c0_8 = arith.constant 0 : index
    %10 = vector.load %arg5[%c0_7, %c0_8] : memref<1x128xf32, #tpu.memory_space<vmem>>, vector<1x128xf32>
    %11 = vector.shape_cast %10 : vector<1x128xf32> to vector<1x128xf32>
    %12 = vector.broadcast %11 : vector<1x128xf32> to vector<8x128xf32>
    %c0_9 = arith.constant 0 : index
    %c0_10 = arith.constant 0 : index
    %13 = vector.load %arg2[%c0_9, %c0_10] : memref<8x32xf32, #tpu.memory_space<vmem>>, vector<8x32xf32>
    %14 = vector.extract_strided_slice %7 {offsets = [0, 0], sizes = [8, 32], strides = [1, 1]} : vector<64x32xf32> to vector<8x32xf32>
    %cst_11 = arith.constant dense<0.000000e+00> : vector<8x32xf32>
    %15 = tpu.matmul %13, %8, %cst_11 {dimension_numbers = #tpu.dot_dimension_numbers<[1], [0], [0], [1], [0, 0, 1, 1], [], []>} : vector<8x32xf32>, vector<32x32xf32>, vector<8x32xf32> -> vector<8x32xf32>
    %16 = arith.addf %14, %15 : vector<8x32xf32>
    %17 = math.tanh %16 : vector<8x32xf32>
    %cst_12 = arith.constant dense<0.000000e+00> : vector<8x128xf32>
    %18 = tpu.matmul %17, %9, %cst_12 {dimension_numbers = #tpu.dot_dimension_numbers<[1], [0], [0], [1], [0, 0, 1, 1], [], []>} : vector<8x32xf32>, vector<32x128xf32>, vector<8x128xf32> -> vector<8x128xf32>
    %19 = arith.addf %18, %12 : vector<8x128xf32>
    %c0_13 = arith.constant 0 : index
    %c0_14 = arith.constant 0 : index
    %c0_15 = arith.constant 0 : index
    %20 = vector.load %arg6[%c0_13, %c0_14, %c0_15] : memref<8x8x128xf32, #tpu.memory_space<vmem>>, vector<1x8x128xf32>
    %21 = vector.shape_cast %20 : vector<1x8x128xf32> to vector<8x128xf32>
    %22 = vector.shape_cast %19 : vector<8x128xf32> to vector<1x8x128xf32>
    tpu.vector_store %arg6[%c0_13, %c0_14, %c0_15], %22 {strides = array<i32>} : memref<8x8x128xf32, #tpu.memory_space<vmem>>, vector<1x8x128xf32>,
    %23 = vector.extract_strided_slice %7 {offsets = [8, 0], sizes = [8, 32], strides = [1, 1]} : vector<64x32xf32> to vector<8x32xf32>
    %cst_16 = arith.constant dense<0.000000e+00> : vector<8x32xf32>
    %24 = tpu.matmul %17, %8, %cst_16 {dimension_numbers = #tpu.dot_dimension_numbers<[1], [0], [0], [1], [0, 0, 1, 1], [], []>} : vector<8x32xf32>, vector<32x32xf32>, vector<8x32xf32> -> vector<8x32xf32>
    %25 = arith.addf %23, %24 : vector<8x32xf32>
    %26 = math.tanh %25 : vector<8x32xf32>
    %cst_17 = arith.constant dense<0.000000e+00> : vector<8x128xf32>
    %27 = tpu.matmul %26, %9, %cst_17 {dimension_numbers = #tpu.dot_dimension_numbers<[1], [0], [0], [1], [0, 0, 1, 1], [], []>} : vector<8x32xf32>, vector<32x128xf32>, vector<8x128xf32> -> vector<8x128xf32>
    %28 = arith.addf %27, %12 : vector<8x128xf32>
    %c1 = arith.constant 1 : index
    %c0_18 = arith.constant 0 : index
    %c0_19 = arith.constant 0 : index
    %29 = vector.load %arg6[%c1, %c0_18, %c0_19] : memref<8x8x128xf32, #tpu.memory_space<vmem>>, vector<1x8x128xf32>
    %30 = vector.shape_cast %29 : vector<1x8x128xf32> to vector<8x128xf32>
    %31 = vector.shape_cast %28 : vector<8x128xf32> to vector<1x8x128xf32>
    tpu.vector_store %arg6[%c1, %c0_18, %c0_19], %31 {strides = array<i32>} : memref<8x8x128xf32, #tpu.memory_space<vmem>>, vector<1x8x128xf32>,
    %32 = vector.extract_strided_slice %7 {offsets = [16, 0], sizes = [8, 32], strides = [1, 1]} : vector<64x32xf32> to vector<8x32xf32>
    %cst_20 = arith.constant dense<0.000000e+00> : vector<8x32xf32>
    %33 = tpu.matmul %26, %8, %cst_20 {dimension_numbers = #tpu.dot_dimension_numbers<[1], [0], [0], [1], [0, 0, 1, 1], [], []>} : vector<8x32xf32>, vector<32x32xf32>, vector<8x32xf32> -> vector<8x32xf32>
    %34 = arith.addf %32, %33 : vector<8x32xf32>
    %35 = math.tanh %34 : vector<8x32xf32>
    %cst_21 = arith.constant dense<0.000000e+00> : vector<8x128xf32>
    %36 = tpu.matmul %35, %9, %cst_21 {dimension_numbers = #tpu.dot_dimension_numbers<[1], [0], [0], [1], [0, 0, 1, 1], [], []>} : vector<8x32xf32>, vector<32x128xf32>, vector<8x128xf32> -> vector<8x128xf32>
    %37 = arith.addf %36, %12 : vector<8x128xf32>
    %c2 = arith.constant 2 : index
    %c0_22 = arith.constant 0 : index
    %c0_23 = arith.constant 0 : index
    %38 = vector.load %arg6[%c2, %c0_22, %c0_23] : memref<8x8x128xf32, #tpu.memory_space<vmem>>, vector<1x8x128xf32>
    %39 = vector.shape_cast %38 : vector<1x8x128xf32> to vector<8x128xf32>
    %40 = vector.shape_cast %37 : vector<8x128xf32> to vector<1x8x128xf32>
    tpu.vector_store %arg6[%c2, %c0_22, %c0_23], %40 {strides = array<i32>} : memref<8x8x128xf32, #tpu.memory_space<vmem>>, vector<1x8x128xf32>,
    %41 = vector.extract_strided_slice %7 {offsets = [24, 0], sizes = [8, 32], strides = [1, 1]} : vector<64x32xf32> to vector<8x32xf32>
    %cst_24 = arith.constant dense<0.000000e+00> : vector<8x32xf32>
    %42 = tpu.matmul %35, %8, %cst_24 {dimension_numbers = #tpu.dot_dimension_numbers<[1], [0], [0], [1], [0, 0, 1, 1], [], []>} : vector<8x32xf32>, vector<32x32xf32>, vector<8x32xf32> -> vector<8x32xf32>
    %43 = arith.addf %41, %42 : vector<8x32xf32>
    %44 = math.tanh %43 : vector<8x32xf32>
    %cst_25 = arith.constant dense<0.000000e+00> : vector<8x128xf32>
    %45 = tpu.matmul %44, %9, %cst_25 {dimension_numbers = #tpu.dot_dimension_numbers<[1], [0], [0], [1], [0, 0, 1, 1], [], []>} : vector<8x32xf32>, vector<32x128xf32>, vector<8x128xf32> -> vector<8x128xf32>
    %46 = arith.addf %45, %12 : vector<8x128xf32>
    %c3 = arith.constant 3 : index
    %c0_26 = arith.constant 0 : index
    %c0_27 = arith.constant 0 : index
    %47 = vector.load %arg6[%c3, %c0_26, %c0_27] : memref<8x8x128xf32, #tpu.memory_space<vmem>>, vector<1x8x128xf32>
    %48 = vector.shape_cast %47 : vector<1x8x128xf32> to vector<8x128xf32>
    %49 = vector.shape_cast %46 : vector<8x128xf32> to vector<1x8x128xf32>
    tpu.vector_store %arg6[%c3, %c0_26, %c0_27], %49 {strides = array<i32>} : memref<8x8x128xf32, #tpu.memory_space<vmem>>, vector<1x8x128xf32>,
    %50 = vector.extract_strided_slice %7 {offsets = [32, 0], sizes = [8, 32], strides = [1, 1]} : vector<64x32xf32> to vector<8x32xf32>
    %cst_28 = arith.constant dense<0.000000e+00> : vector<8x32xf32>
    %51 = tpu.matmul %44, %8, %cst_28 {dimension_numbers = #tpu.dot_dimension_numbers<[1], [0], [0], [1], [0, 0, 1, 1], [], []>} : vector<8x32xf32>, vector<32x32xf32>, vector<8x32xf32> -> vector<8x32xf32>
    %52 = arith.addf %50, %51 : vector<8x32xf32>
    %53 = math.tanh %52 : vector<8x32xf32>
    %cst_29 = arith.constant dense<0.000000e+00> : vector<8x128xf32>
    %54 = tpu.matmul %53, %9, %cst_29 {dimension_numbers = #tpu.dot_dimension_numbers<[1], [0], [0], [1], [0, 0, 1, 1], [], []>} : vector<8x32xf32>, vector<32x128xf32>, vector<8x128xf32> -> vector<8x128xf32>
    %55 = arith.addf %54, %12 : vector<8x128xf32>
    %c4 = arith.constant 4 : index
    %c0_30 = arith.constant 0 : index
    %c0_31 = arith.constant 0 : index
    %56 = vector.load %arg6[%c4, %c0_30, %c0_31] : memref<8x8x128xf32, #tpu.memory_space<vmem>>, vector<1x8x128xf32>
    %57 = vector.shape_cast %56 : vector<1x8x128xf32> to vector<8x128xf32>
    %58 = vector.shape_cast %55 : vector<8x128xf32> to vector<1x8x128xf32>
    tpu.vector_store %arg6[%c4, %c0_30, %c0_31], %58 {strides = array<i32>} : memref<8x8x128xf32, #tpu.memory_space<vmem>>, vector<1x8x128xf32>,
    %59 = vector.extract_strided_slice %7 {offsets = [40, 0], sizes = [8, 32], strides = [1, 1]} : vector<64x32xf32> to vector<8x32xf32>
    %cst_32 = arith.constant dense<0.000000e+00> : vector<8x32xf32>
    %60 = tpu.matmul %53, %8, %cst_32 {dimension_numbers = #tpu.dot_dimension_numbers<[1], [0], [0], [1], [0, 0, 1, 1], [], []>} : vector<8x32xf32>, vector<32x32xf32>, vector<8x32xf32> -> vector<8x32xf32>
    %61 = arith.addf %59, %60 : vector<8x32xf32>
    %62 = math.tanh %61 : vector<8x32xf32>
    %cst_33 = arith.constant dense<0.000000e+00> : vector<8x128xf32>
    %63 = tpu.matmul %62, %9, %cst_33 {dimension_numbers = #tpu.dot_dimension_numbers<[1], [0], [0], [1], [0, 0, 1, 1], [], []>} : vector<8x32xf32>, vector<32x128xf32>, vector<8x128xf32> -> vector<8x128xf32>
    %64 = arith.addf %63, %12 : vector<8x128xf32>
    %c5 = arith.constant 5 : index
    %c0_34 = arith.constant 0 : index
    %c0_35 = arith.constant 0 : index
    %65 = vector.load %arg6[%c5, %c0_34, %c0_35] : memref<8x8x128xf32, #tpu.memory_space<vmem>>, vector<1x8x128xf32>
    %66 = vector.shape_cast %65 : vector<1x8x128xf32> to vector<8x128xf32>
    %67 = vector.shape_cast %64 : vector<8x128xf32> to vector<1x8x128xf32>
    tpu.vector_store %arg6[%c5, %c0_34, %c0_35], %67 {strides = array<i32>} : memref<8x8x128xf32, #tpu.memory_space<vmem>>, vector<1x8x128xf32>,
    %68 = vector.extract_strided_slice %7 {offsets = [48, 0], sizes = [8, 32], strides = [1, 1]} : vector<64x32xf32> to vector<8x32xf32>
    %cst_36 = arith.constant dense<0.000000e+00> : vector<8x32xf32>
    %69 = tpu.matmul %62, %8, %cst_36 {dimension_numbers = #tpu.dot_dimension_numbers<[1], [0], [0], [1], [0, 0, 1, 1], [], []>} : vector<8x32xf32>, vector<32x32xf32>, vector<8x32xf32> -> vector<8x32xf32>
    %70 = arith.addf %68, %69 : vector<8x32xf32>
    %71 = math.tanh %70 : vector<8x32xf32>
    %cst_37 = arith.constant dense<0.000000e+00> : vector<8x128xf32>
    %72 = tpu.matmul %71, %9, %cst_37 {dimension_numbers = #tpu.dot_dimension_numbers<[1], [0], [0], [1], [0, 0, 1, 1], [], []>} : vector<8x32xf32>, vector<32x128xf32>, vector<8x128xf32> -> vector<8x128xf32>
    %73 = arith.addf %72, %12 : vector<8x128xf32>
    %c6 = arith.constant 6 : index
    %c0_38 = arith.constant 0 : index
    %c0_39 = arith.constant 0 : index
    %74 = vector.load %arg6[%c6, %c0_38, %c0_39] : memref<8x8x128xf32, #tpu.memory_space<vmem>>, vector<1x8x128xf32>
    %75 = vector.shape_cast %74 : vector<1x8x128xf32> to vector<8x128xf32>
    %76 = vector.shape_cast %73 : vector<8x128xf32> to vector<1x8x128xf32>
    tpu.vector_store %arg6[%c6, %c0_38, %c0_39], %76 {strides = array<i32>} : memref<8x8x128xf32, #tpu.memory_space<vmem>>, vector<1x8x128xf32>,
    %77 = vector.extract_strided_slice %7 {offsets = [56, 0], sizes = [8, 32], strides = [1, 1]} : vector<64x32xf32> to vector<8x32xf32>
    %cst_40 = arith.constant dense<0.000000e+00> : vector<8x32xf32>
    %78 = tpu.matmul %71, %8, %cst_40 {dimension_numbers = #tpu.dot_dimension_numbers<[1], [0], [0], [1], [0, 0, 1, 1], [], []>} : vector<8x32xf32>, vector<32x32xf32>, vector<8x32xf32> -> vector<8x32xf32>
    %79 = arith.addf %77, %78 : vector<8x32xf32>
    %80 = math.tanh %79 : vector<8x32xf32>
    %cst_41 = arith.constant dense<0.000000e+00> : vector<8x128xf32>
    %81 = tpu.matmul %80, %9, %cst_41 {dimension_numbers = #tpu.dot_dimension_numbers<[1], [0], [0], [1], [0, 0, 1, 1], [], []>} : vector<8x32xf32>, vector<32x128xf32>, vector<8x128xf32> -> vector<8x128xf32>
    %82 = arith.addf %81, %12 : vector<8x128xf32>
    %c7 = arith.constant 7 : index
    %c0_42 = arith.constant 0 : index
    %c0_43 = arith.constant 0 : index
    %83 = vector.load %arg6[%c7, %c0_42, %c0_43] : memref<8x8x128xf32, #tpu.memory_space<vmem>>, vector<1x8x128xf32>
    %84 = vector.shape_cast %83 : vector<1x8x128xf32> to vector<8x128xf32>
    %85 = vector.shape_cast %82 : vector<8x128xf32> to vector<1x8x128xf32>
    tpu.vector_store %arg6[%c7, %c0_42, %c0_43], %85 {strides = array<i32>} : memref<8x8x128xf32, #tpu.memory_space<vmem>>, vector<1x8x128xf32>,
    %c0_44 = arith.constant 0 : index
    %c0_45 = arith.constant 0 : index
    %86 = vector.load %arg7[%c0_44, %c0_45] : memref<8x32xf32, #tpu.memory_space<vmem>>, vector<8x32xf32>
    tpu.vector_store %arg7[%c0_44, %c0_45], %80 {strides = array<i32>} : memref<8x32xf32, #tpu.memory_space<vmem>>, vector<8x32xf32>,
    return
  }
}

</mosaic_0001>

<bundles_post_ra>
// kernel: decoder_forward.1
= control target key start
LH: loop header
LB: loop body
LE: loop exit
PB: predicated region body
PF: predicated region fallthrough
CT: control target
= control target key end

     0   :  { %v1794_v0 = vmov 0   ;;  %v1795_v6 = vmov 0.0   ;;  %vm1796_vm0 = vmmov 0   ;;  %vm220_vm1 = vcmask 261120   ;;  %s2197_s0 = inlined_call_operand.vmem [shape: s32[64,1], index: 0, kind: input, shape index: {}]   ;;  %s2198_s1 = inlined_call_operand.vmem [shape: f32[128,32], index: 1, kind: input, shape index: {}]   ;;  %s2199_s3 = inlined_call_operand.vmem [shape: f32[32,32], index: 3, kind: input, shape index: {}]   ;;  %s2200_s2 = inlined_call_operand.vmem [shape: f32[8,32], index: 2, kind: input, shape index: {}]   ;;  %s2201_s4 = inlined_call_operand.vmem [shape: f32[32,128], index: 4, kind: input, shape index: {}]   ;;  %s2202_s5 = inlined_call_operand.vmem [shape: f32[1,128], index: 5, kind: input, shape index: {}]   ;;  %s2203_s6 = inlined_call_operand.vmem [shape: f32[8,8,128], index: 6, kind: output, shape index: {0}]   ;;  %s2204_s7 = inlined_call_operand.vmem [shape: f32[8,32], index: 7, kind: output, shape index: {1}]  }
   0x1   :  { %1776 = vset.pattern.permute.xlu0 %v1794_v0  ;;  %v25_v1 = vld [vmem:[%s2197_s0] sm:$0xff]  ;;  %1777 = vset.pattern.permute.xlu1 %v1794_v0  ;;  %v27_v2 = vld [vmem:[%s2197_s0 + $0x10] sm:$0xff]  ;;  %v26_v3 = vld [vmem:[%s2197_s0 + $0x8] sm:$0xff]  ;;  %v33_v30 = vlaneseq  ;;  %v1797_v34 = vmov 1.0  }
   0x2   :  { %36 = vperm.xlu0 %1776, %v25_v1   ;;  %42 = vperm.xlu1 %1777, %v27_v2   ;;  %v28_v4 = vld [vmem:[%s2197_s0 + $0x18] sm:$0xff]  ;;  %v97_v7 = vld [vmem:[%s2198_s1 + $0x70] sm:$0xff]  ;;  %v96_v8 = vld [vmem:[%s2198_s1 + $0x68] sm:$0xff] }
   0x3   :  { %v98_v5 = vld [vmem:[%s2198_s1 + $0x78] sm:$0xff]  ;;  %1596 = vmatprep.subr.mxu1 %v1795_v6  ;;  %1604 = vmatprep.mubr.msk.f32.mxu1 %vm1796_vm0, %v1795_v6  ;;  %v29_v9 = vld [vmem:[%s2197_s0 + $0x20] sm:$0xff]  ;;  %v30_v10 = vld [vmem:[%s2197_s0 + $0x28] sm:$0xff]  ;;  %v1945_v31 = vand.u32 127, %v33_v30 }
   0x4   :  { %1552 = vmatprep.subr.mxu0 %v98_v5  ;;  %v1871_v11 = vld [vmem:[%s2199_s3 + $0x18] sm:$0xff]  ;;  %v1877_v12 = vld [vmem:[%s2199_s3 + $0x10] sm:$0xff]  ;;  %v95_v13 = vld [vmem:[%s2198_s1 + $0x60] sm:$0xff] }
   0x5   :  { %1553 = vmatpush3.msra.mxu0 %v98_v5  ;;  %1597 = vmatpush3.msra.mxu1 %v1871_v11  ;;  %v1886_v14 = vld [vmem:[%s2199_s3 + $0x8] sm:$0xff]  ;;  %v31_v15 = vld [vmem:[%s2197_s0 + $0x30] sm:$0xff]  ;;  %v94_v16 = vld [vmem:[%s2198_s1 + $0x58] sm:$0xff] }
   0x6   :  { %39 = vperm.xlu0 %1776, %v26_v3   ;;  %45 = vperm.xlu1 %1777, %v28_v4   ;;  %v93_v17 = vld [vmem:[%s2198_s1 + $0x50] sm:$0xff]  ;;  %v1903_v18 = vld [vmem:[%s2199_s3] sm:$0xff]  ;;  %v92_v20 = vld [vmem:[%s2198_s1 + $0x48] sm:$0xff] }
   0x7   :  { %1554 = vmatprep.subr.mxu0 %v97_v7  ;;  %1598 = vmatprep.subr.mxu1 %v1795_v6  ;;  %v219_v19 = vld [vmem:[%s2200_s2] sm:$0xff]  ;;  %v90_v22 = vld [vmem:[%s2198_s1 + $0x38] sm:$0xff]  ;;  %v89_v23 = vld [vmem:[%s2198_s1 + $0x30] sm:$0xff] }
   0x8   :  { %1555 = vmatpush3.msra.mxu0 %v97_v7  ;;  %1599 = vmatpush3.msra.mxu1 %v1877_v12  ;;  %v91_v21 = vld [vmem:[%s2198_s1 + $0x40] sm:$0xff]  ;;  %v88_v24 = vld [vmem:[%s2198_s1 + $0x28] sm:$0xff]  ;;  %v86_v26 = vld [vmem:[%s2198_s1 + $0x18] sm:$0xff] }
   0x9   :  { %1556 = vmatprep.subr.mxu0 %v96_v8  ;;  %1600 = vmatprep.subr.mxu1 %v1795_v6  ;;  %v87_v25 = vld [vmem:[%s2198_s1 + $0x20] sm:$0xff]  ;;  %v85_v27 = vld [vmem:[%s2198_s1 + $0x10] sm:$0xff]  ;;  %v84_v28 = vld [vmem:[%s2198_s1 + $0x8] sm:$0xff] }
   0xa   :  { %48 = vperm.xlu0 %1776, %v29_v9   ;;  %51 = vperm.xlu1 %1777, %v30_v10   ;;  %v83_v29 = vld [vmem:[%s2198_s1] sm:$0xff]  ;;  %v1964_v40 = vld [vmem:[%s2201_s4 + $0x18] sm:$0xff]  ;;  %v1969_v41 = vld [vmem:[%s2201_s4 + $0x10] sm:$0xff] }
   0xb   :  { %1557 = vmatpush3.msra.mxu0 %v96_v8  ;;  %1601 = vmatpush3.msra.mxu1 %v1886_v14  ;;  %v1977_v42 = vld [vmem:[%s2201_s4 + $0x8] sm:$0xff]  ;;  %v1986_v43 = vld [vmem:[%s2201_s4] sm:$0xff]  ;;  %v32_v46 = vld [vmem:[%s2197_s0 + $0x38] sm:$0xff] }
   0xc   :  { %1558 = vmatprep.subr.mxu0 %v95_v13  ;;  %1602 = vmatprep.subr.mxu1 %v1795_v6  ;;  %v2029_v52 = vld [vmem:[%s2202_s5] ss:$0 sm:$0xff] }
   0xd   :  { %1559 = vmatpush3.msra.mxu0 %v95_v13  ;;  %1603 = vmatpush3.msra.mxu1 %v1903_v18 }
   0xe   :  { %54 = vperm.xlu0 %1776, %v31_v15   ;;  %1560 = vmatprep.subr.mxu0 %v94_v16 }
   0xf   :  { %1561 = vmatpush3.msra.mxu0 %v94_v16  ;;  %1605 = vmatmul.mubr.msk.f32.vlgmr.msra.gmra.mxu1 %vm220_vm1, %v219_v19 }
  0x10   :  { %1562 = vmatprep.subr.mxu0 %v93_v17  ;;  %1607 = vmatprep.subr.mxu1 %v1795_v6 }
  0x11   :  { %1563 = vmatpush3.msra.mxu0 %v93_v17  ;;  %1615 = vmatprep.mubr.msk.f32.mxu1 %vm1796_vm0, %v1795_v6 }
  0x12   :  { %1564 = vmatprep.subr.mxu0 %v92_v20  ;;  %1608 = vmatpush3.msra.mxu1 %v1964_v40 }
  0x13   :  { %1565 = vmatpush3.msra.mxu0 %v92_v20  ;;  %1609 = vmatprep.subr.mxu1 %v1795_v6 }
  0x14   :  { %1566 = vmatprep.subr.mxu0 %v91_v21  ;;  %1610 = vmatpush3.msra.mxu1 %v1969_v41 }
  0x15   :  { %1567 = vmatpush3.msra.mxu0 %v91_v21  ;;  %1611 = vmatprep.subr.mxu1 %v1795_v6 }
  0x16   :  { %1568 = vmatprep.subr.mxu0 %v90_v22  ;;  %1612 = vmatpush3.msra.mxu1 %v1977_v42 }
  0x17   :  { %1569 = vmatpush3.msra.mxu0 %v90_v22  ;;  %1613 = vmatprep.subr.mxu1 %v1795_v6 }
  0x18   :  { %1570 = vmatprep.subr.mxu0 %v89_v23  ;;  %1614 = vmatpush3.msra.mxu1 %v1986_v43 }
  0x19   :  { %1571 = vmatpush3.msra.mxu0 %v89_v23  ;;  %1618 = vmatprep.subr.mxu1 %v1795_v6 }
  0x1a   :  { %1572 = vmatprep.subr.mxu0 %v88_v24  ;;  %57 = vperm.xlu1 %1777, %v32_v46  }
  0x1b   :  { %1573 = vmatpush3.msra.mxu0 %v88_v24 }
  0x1c   :  { %1574 = vmatprep.subr.mxu0 %v87_v25 }
  0x1d   :  { %1575 = vmatpush3.msra.mxu0 %v87_v25 }
  0x1e   :  { %1576 = vmatprep.subr.mxu0 %v86_v26 }
  0x1f   :  { %1577 = vmatpush3.msra.mxu0 %v86_v26 }
  0x20   :  { %1578 = vmatprep.subr.mxu0 %v85_v27 }
  0x21   :  { %1579 = vmatpush3.msra.mxu0 %v85_v27 }
  0x22   :  { %1580 = vmatprep.subr.mxu0 %v84_v28 }
  0x23   :  { %1581 = vmatpush3.msra.mxu0 %v84_v28 }
  0x24   :  { %1582 = vmatprep.subr.mxu0 %v83_v29 }
  0x25   :  { %1583 = vmatpush3.msra.mxu0 %v83_v29 }
  0x26   :  { %1651 = vmatprep.subr.mxu0 %v1795_v6 }
  0x7d   :  { %v37_v32 = vpop.permute.xlu0 %36  ;;  %v43_v33 = vpop.permute.xlu1 %42 }
  0x7e   :  { %vm59_vm2 = vcmp.eq.s32.totalorder %v37_v32, %v1945_v31  ;;  %vm61_vm3 = vcmp.eq.s32.totalorder %v43_v33, %v1945_v31 }
  0x7f   :  { %1584 = vmatprep.mubr.msk.f32.mxu0 %vm59_vm2, %v1797_v34 }
  0x81   :  { %v40_v35 = vpop.permute.xlu0 %39  ;;  %v46_v36 = vpop.permute.xlu1 %45 }
  0x82   :  { %vm60_vm4 = vcmp.eq.s32.totalorder %v40_v35, %v1945_v31  ;;  %vm62_vm5 = vcmp.eq.s32.totalorder %v46_v36, %v1945_v31 }
  0x83   :  { %1585 = vmatmul.mubr.msk.f32.vlgmr.msra.gmra.mxu0 %vm60_vm4, %v1797_v34 }
  0x84   :  { %1587 = vmatprep.mubr.msk.f32.mxu0 %vm61_vm3, %v1797_v34  ;;  %1652 = vmatpush3.msra.mxu0 %v1964_v40 }
  0x85   :  { %v49_v37 = vpop.permute.xlu0 %48  ;;  %v52_v38 = vpop.permute.xlu1 %51  ;;  %1653 = vmatprep.subr.mxu0 %v1795_v6 }
  0x86   :  { %vm63_vm6 = vcmp.eq.s32.totalorder %v49_v37, %v1945_v31  ;;  %vm64_vm7 = vcmp.eq.s32.totalorder %v52_v38, %v1945_v31  ;;  %1654 = vmatpush3.msra.mxu0 %v1969_v41 }
  0x87   :  { %1588 = vmatmul.mubr.msk.f32.gmra.mxu0 %vm62_vm5, %v1797_v34  ;;  %1655 = vmatprep.subr.mxu0 %v1795_v6 }
  0x88   :  { %1590 = vmatprep.mubr.msk.f32.mxu0 %vm63_vm6, %v1797_v34  ;;  %1656 = vmatpush3.msra.mxu0 %v1977_v42 }
  0x89   :  { %v55_v39 = vpop.permute.xlu0 %54  ;;  %1657 = vmatprep.subr.mxu0 %v1795_v6 }
  0x8a   :  { %vm65_vm8 = vcmp.eq.s32.totalorder %v55_v39, %v1945_v31  ;;  %1658 = vmatpush3.msra.mxu0 %v1986_v43 }
  0x8b   :  { %1591 = vmatmul.mubr.msk.f32.gmra.mxu0 %vm64_vm7, %v1797_v34  ;;  %1673 = vmatprep.subr.mxu0 %v1795_v6 }
  0x8c   :  { %1593 = vmatprep.mubr.msk.f32.mxu0 %vm65_vm8, %v1797_v34 }
  0x95   :  { %v58_v51 = vpop.permute.xlu1 %57 }
  0x96   :  { %vm66_vm9 = vcmp.eq.s32.totalorder %v58_v51, %v1945_v31 }
  0x97   :  { %1594 = vmatmul.mubr.msk.f32.gmra.mxu0 %vm66_vm9, %v1797_v34 }
  0x98   :  { %1659 = vmatprep.mubr.msk.f32.mxu0 %vm1796_vm0, %v1795_v6 }
  0xcf   :  { %v290_v44 = vpop.f32.mrf.mxu1 }
  0xd1   :  { %v1606_v45 = vpop.f32.mrf.mxu1 }
 0x143   :  { %v1586_v47 = vpop.f32.mrf.mxu0 }
 0x145   :  { %v165_v48 = vpop.f32.mrf.mxu0 }
 0x146   :  { %v294_v49 = vadd.f32 %v290_v44, %v165_v48 }
 0x147   :  { %v1589_v63 = vpop.f32.mrf.mxu0 }
 0x148   :  { %1778 = vtanh.f32 %v294_v49 }
 0x149   :  { %v175_v0 = vpop.f32.mrf.mxu0 }
 0x14b   :  { %v2083_v5 = vpop.f32.mrf.mxu0 }
 0x14d   :  { %v185_v7 = vpop.f32.mrf.mxu0 }
 0x155   :  { %v1779_v50 = vpop.eup %1778 }
 0x156   :  { %1616 = vmatmul.mubr.msk.f32.vlgmr.msra.gmra.mxu1 %vm220_vm1, %v1779_v50 }
 0x157   :  { %1619 = vmatpush3.msra.mxu1 %v1871_v11  ;;  %1626 = vmatprep.mubr.msk.f32.mxu1 %vm1796_vm0, %v1795_v6  ;;  %v2085_v8 = vpop.f32.mrf.mxu0 }
 0x158   :  { %1620 = vmatprep.subr.mxu1 %v1795_v6 }
 0x159   :  { %1621 = vmatpush3.msra.mxu1 %v1877_v12  ;;  %v2087_v9 = vpop.f32.mrf.mxu0 }
 0x15a   :  { %1622 = vmatprep.subr.mxu1 %v1795_v6 }
 0x15b   :  { %1623 = vmatpush3.msra.mxu1 %v1886_v14 }
 0x15c   :  { %1624 = vmatprep.subr.mxu1 %v1795_v6 }
 0x15d   :  { %1625 = vmatpush3.msra.mxu1 %v1903_v18 }
 0x15e   :  { %1627 = vmatmul.mubr.msk.f32.vlgmr.msra.gmra.mxu1 %vm220_vm1, %v1779_v50  ;;  %1629 = vmatprep.subr.mxu1 %v1795_v6 }
 0x15f   :  { %1630 = vmatpush3.msra.mxu1 %v1964_v40  ;;  %1637 = vmatprep.mubr.msk.f32.mxu1 %vm1796_vm0, %v1795_v6 }
 0x160   :  { %1631 = vmatprep.subr.mxu1 %v1795_v6 }
 0x161   :  { %1632 = vmatpush3.msra.mxu1 %v1969_v41 }
 0x162   :  { %1633 = vmatprep.subr.mxu1 %v1795_v6 }
 0x163   :  { %1634 = vmatpush3.msra.mxu1 %v1977_v42 }
 0x164   :  { %1635 = vmatprep.subr.mxu1 %v1795_v6 }
 0x165   :  { %1636 = vmatpush3.msra.mxu1 %v1986_v43 }
 0x166   :  { %1640 = vmatprep.subr.mxu1 %v1795_v6 }
 0x216   :  { %v365_v53 = vpop.f32.mrf.mxu1 }
 0x217   :  { %v366_v54 = vadd.f32 %v2029_v52, %v365_v53 }
 0x218   :  { %v1617_v55 = vpop.f32.mrf.mxu1 }
 0x219   :  { %369 = vst [vmem:[%s2203_s6] sm:$0xff] %v366_v54 }
 0x21e   :  { %v436_v56 = vpop.f32.mrf.mxu1 }
 0x21f   :  { %v440_v57 = vadd.f32 %v1586_v47, %v436_v56 }
 0x220   :  { %v1628_v58 = vpop.f32.mrf.mxu1 }
 0x221   :  { %1780 = vtanh.f32 %v440_v57 }
 0x22e   :  { %v1781_v59 = vpop.eup %1780 }
 0x22f   :  { %1638 = vmatmul.mubr.msk.f32.vlgmr.msra.gmra.mxu1 %vm220_vm1, %v1781_v59 }
 0x230   :  { %1641 = vmatpush3.msra.mxu1 %v1871_v11  ;;  %1648 = vmatprep.mubr.msk.f32.mxu1 %vm1796_vm0, %v1795_v6 }
 0x231   :  { %1642 = vmatprep.subr.mxu1 %v1795_v6 }
 0x232   :  { %1643 = vmatpush3.msra.mxu1 %v1877_v12 }
 0x233   :  { %1644 = vmatprep.subr.mxu1 %v1795_v6 }
 0x234   :  { %1645 = vmatpush3.msra.mxu1 %v1886_v14 }
 0x235   :  { %1646 = vmatprep.subr.mxu1 %v1795_v6 }
 0x236   :  { %1647 = vmatpush3.msra.mxu1 %v1903_v18 }
 0x237   :  { %1649 = vmatmul.mubr.msk.f32.vlgmr.msra.gmra.mxu1 %vm220_vm1, %v1781_v59  ;;  %1662 = vmatprep.subr.mxu1 %v1795_v6 }
 0x238   :  { %1663 = vmatpush3.msra.mxu1 %v1871_v11  ;;  %1670 = vmatprep.mubr.msk.f32.mxu1 %vm1796_vm0, %v1795_v6 }
 0x239   :  { %1664 = vmatprep.subr.mxu1 %v1795_v6 }
 0x23a   :  { %1665 = vmatpush3.msra.mxu1 %v1877_v12 }
 0x23b   :  { %1666 = vmatprep.subr.mxu1 %v1795_v6 }
 0x23c   :  { %1667 = vmatpush3.msra.mxu1 %v1886_v14 }
 0x23d   :  { %1668 = vmatprep.subr.mxu1 %v1795_v6 }
 0x23e   :  { %1669 = vmatpush3.msra.mxu1 %v1903_v18 }
 0x23f   :  { %1684 = vmatprep.subr.mxu1 %v1795_v6 }
 0x2ef   :  { %v511_v60 = vpop.f32.mrf.mxu1 }
 0x2f0   :  { %v512_v61 = vadd.f32 %v2029_v52, %v511_v60 }
 0x2f1   :  { %v1639_v62 = vpop.f32.mrf.mxu1 }
 0x2f2   :  { %1429 = vst [vmem:[%s2203_s6 + $0x8] sm:$0xff] %v512_v61 }
 0x2f7   :  { %v583_v1 = vpop.f32.mrf.mxu1 }
 0x2f8   :  { %v587_v2 = vadd.f32 %v583_v1, %v175_v0 }
 0x2f9   :  { %v1650_v3 = vpop.f32.mrf.mxu1 }
 0x2fa   :  { %1782 = vtanh.f32 %v587_v2 }
 0x307   :  { %v1783_v4 = vpop.eup %1782 }
 0x308   :  { %1660 = vmatmul.mubr.msk.f32.vlgmr.msra.gmra.mxu0 %vm220_vm1, %v1783_v4  ;;  %1671 = vmatmul.mubr.msk.f32.vlgmr.msra.gmra.mxu1 %vm220_vm1, %v1783_v4 }
 0x309   :  { %1674 = vmatpush3.msra.mxu0 %v1964_v40  ;;  %1685 = vmatpush3.msra.mxu1 %v1871_v11 }
 0x30a   :  { %1675 = vmatprep.subr.mxu0 %v1795_v6  ;;  %1686 = vmatprep.subr.mxu1 %v1795_v6 }
 0x30b   :  { %1676 = vmatpush3.msra.mxu0 %v1969_v41  ;;  %1687 = vmatpush3.msra.mxu1 %v1877_v12 }
 0x30c   :  { %1677 = vmatprep.subr.mxu0 %v1795_v6  ;;  %1688 = vmatprep.subr.mxu1 %v1795_v6 }
 0x30d   :  { %1678 = vmatpush3.msra.mxu0 %v1977_v42  ;;  %1689 = vmatpush3.msra.mxu1 %v1886_v14 }
 0x30e   :  { %1679 = vmatprep.subr.mxu0 %v1795_v6  ;;  %1690 = vmatprep.subr.mxu1 %v1795_v6 }
 0x30f   :  { %1680 = vmatpush3.msra.mxu0 %v1986_v43  ;;  %1681 = vmatprep.mubr.msk.f32.mxu0 %vm1796_vm0, %v1795_v6 }
 0x310   :  { %1691 = vmatpush3.msra.mxu1 %v1903_v18  ;;  %1692 = vmatprep.mubr.msk.f32.mxu1 %vm1796_vm0, %v1795_v6 }
 0x311   :  { %1695 = vmatprep.subr.mxu0 %v1795_v6  ;;  %1706 = vmatprep.subr.mxu1 %v1795_v6 }
 0x3c8   :  { %v658_v10 = vpop.f32.mrf.mxu0  ;;  %v730_v13 = vpop.f32.mrf.mxu1 }
 0x3c9   :  { %v659_v15 = vadd.f32 %v2029_v52, %v658_v10  ;;  %v734_v16 = vadd.f32 %v1589_v63, %v730_v13 }
 0x3ca   :  { %v1661_v17 = vpop.f32.mrf.mxu0  ;;  %v1672_v19 = vpop.f32.mrf.mxu1 }
 0x3cb   :  { %1432 = vst [vmem:[%s2203_s6 + $0x10] sm:$0xff] %v659_v15  ;;  %1784 = vtanh.f32 %v734_v16 }
 0x3d8   :  { %v1785_v20 = vpop.eup %1784 }
 0x3d9   :  { %1682 = vmatmul.mubr.msk.f32.vlgmr.msra.gmra.mxu0 %vm220_vm1, %v1785_v20  ;;  %1693 = vmatmul.mubr.msk.f32.vlgmr.msra.gmra.mxu1 %vm220_vm1, %v1785_v20 }
 0x3da   :  { %1696 = vmatpush3.msra.mxu0 %v1964_v40  ;;  %1707 = vmatpush3.msra.mxu1 %v1871_v11 }
 0x3db   :  { %1697 = vmatprep.subr.mxu0 %v1795_v6  ;;  %1708 = vmatprep.subr.mxu1 %v1795_v6 }
 0x3dc   :  { %1698 = vmatpush3.msra.mxu0 %v1969_v41  ;;  %1709 = vmatpush3.msra.mxu1 %v1877_v12 }
 0x3dd   :  { %1699 = vmatprep.subr.mxu0 %v1795_v6  ;;  %1710 = vmatprep.subr.mxu1 %v1795_v6 }
 0x3de   :  { %1700 = vmatpush3.msra.mxu0 %v1977_v42  ;;  %1711 = vmatpush3.msra.mxu1 %v1886_v14 }
 0x3df   :  { %1701 = vmatprep.subr.mxu0 %v1795_v6  ;;  %1712 = vmatprep.subr.mxu1 %v1795_v6 }
 0x3e0   :  { %1702 = vmatpush3.msra.mxu0 %v1986_v43  ;;  %1703 = vmatprep.mubr.msk.f32.mxu0 %vm1796_vm0, %v1795_v6 }
 0x3e1   :  { %1713 = vmatpush3.msra.mxu1 %v1903_v18  ;;  %1714 = vmatprep.mubr.msk.f32.mxu1 %vm1796_vm0, %v1795_v6 }
 0x3e2   :  { %1717 = vmatprep.subr.mxu0 %v1795_v6  ;;  %1728 = vmatprep.subr.mxu1 %v1795_v6 }
 0x499   :  { %v805_v21 = vpop.f32.mrf.mxu0  ;;  %v877_v22 = vpop.f32.mrf.mxu1 }
 0x49a   :  { %v806_v23 = vadd.f32 %v2029_v52, %v805_v21  ;;  %v881_v24 = vadd.f32 %v877_v22, %v185_v7 }
 0x49b   :  { %v1683_v25 = vpop.f32.mrf.mxu0  ;;  %v1694_v26 = vpop.f32.mrf.mxu1 }
 0x49c   :  { %1435 = vst [vmem:[%s2203_s6 + $0x18] sm:$0xff] %v806_v23  ;;  %1786 = vtanh.f32 %v881_v24 }
 0x4a9   :  { %v1787_v27 = vpop.eup %1786 }
 0x4aa   :  { %1704 = vmatmul.mubr.msk.f32.vlgmr.msra.gmra.mxu0 %vm220_vm1, %v1787_v27  ;;  %1715 = vmatmul.mubr.msk.f32.vlgmr.msra.gmra.mxu1 %vm220_vm1, %v1787_v27 }
 0x4ab   :  { %1718 = vmatpush3.msra.mxu0 %v1964_v40  ;;  %1729 = vmatpush3.msra.mxu1 %v1871_v11 }
 0x4ac   :  { %1719 = vmatprep.subr.mxu0 %v1795_v6  ;;  %1730 = vmatprep.subr.mxu1 %v1795_v6 }
 0x4ad   :  { %1720 = vmatpush3.msra.mxu0 %v1969_v41  ;;  %1731 = vmatpush3.msra.mxu1 %v1877_v12 }
 0x4ae   :  { %1721 = vmatprep.subr.mxu0 %v1795_v6  ;;  %1732 = vmatprep.subr.mxu1 %v1795_v6 }
 0x4af   :  { %1722 = vmatpush3.msra.mxu0 %v1977_v42  ;;  %1733 = vmatpush3.msra.mxu1 %v1886_v14 }
 0x4b0   :  { %1723 = vmatprep.subr.mxu0 %v1795_v6  ;;  %1734 = vmatprep.subr.mxu1 %v1795_v6 }
 0x4b1   :  { %1724 = vmatpush3.msra.mxu0 %v1986_v43  ;;  %1725 = vmatprep.mubr.msk.f32.mxu0 %vm1796_vm0, %v1795_v6 }
 0x4b2   :  { %1735 = vmatpush3.msra.mxu1 %v1903_v18  ;;  %1736 = vmatprep.mubr.msk.f32.mxu1 %vm1796_vm0, %v1795_v6 }
 0x4b3   :  { %1739 = vmatprep.subr.mxu0 %v1795_v6  ;;  %1750 = vmatprep.subr.mxu1 %v1795_v6 }
 0x56a   :  { %v952_v28 = vpop.f32.mrf.mxu0  ;;  %v1024_v29 = vpop.f32.mrf.mxu1 }
 0x56b   :  { %v953_v30 = vadd.f32 %v2029_v52, %v952_v28  ;;  %v1028_v31 = vadd.f32 %v2083_v5, %v1024_v29 }
 0x56c   :  { %v1705_v32 = vpop.f32.mrf.mxu0  ;;  %v1716_v33 = vpop.f32.mrf.mxu1 }
 0x56d   :  { %1438 = vst [vmem:[%s2203_s6 + $0x20] sm:$0xff] %v953_v30  ;;  %1788 = vtanh.f32 %v1028_v31 }
 0x57a   :  { %v1789_v34 = vpop.eup %1788 }
 0x57b   :  { %1726 = vmatmul.mubr.msk.f32.vlgmr.msra.gmra.mxu0 %vm220_vm1, %v1789_v34  ;;  %1737 = vmatmul.mubr.msk.f32.vlgmr.msra.gmra.mxu1 %vm220_vm1, %v1789_v34 }
 0x57c   :  { %1740 = vmatpush3.msra.mxu0 %v1964_v40  ;;  %1751 = vmatpush3.msra.mxu1 %v1871_v11 }
 0x57d   :  { %1741 = vmatprep.subr.mxu0 %v1795_v6  ;;  %1752 = vmatprep.subr.mxu1 %v1795_v6 }
 0x57e   :  { %1742 = vmatpush3.msra.mxu0 %v1969_v41  ;;  %1753 = vmatpush3.msra.mxu1 %v1877_v12 }
 0x57f   :  { %1743 = vmatprep.subr.mxu0 %v1795_v6  ;;  %1754 = vmatprep.subr.mxu1 %v1795_v6 }
 0x580   :  { %1744 = vmatpush3.msra.mxu0 %v1977_v42  ;;  %1755 = vmatpush3.msra.mxu1 %v1886_v14 }
 0x581   :  { %1745 = vmatprep.subr.mxu0 %v1795_v6  ;;  %1756 = vmatprep.subr.mxu1 %v1795_v6 }
 0x582   :  { %1746 = vmatpush3.msra.mxu0 %v1986_v43  ;;  %1747 = vmatprep.mubr.msk.f32.mxu0 %vm1796_vm0, %v1795_v6 }
 0x583   :  { %1757 = vmatpush3.msra.mxu1 %v1903_v18  ;;  %1758 = vmatprep.mubr.msk.f32.mxu1 %vm1796_vm0, %v1795_v6 }
 0x584   :  { %1761 = vmatprep.subr.mxu0 %v1795_v6 }
 0x63b   :  { %v1099_v11 = vpop.f32.mrf.mxu0  ;;  %v1171_v12 = vpop.f32.mrf.mxu1 }
 0x63c   :  { %v1100_v14 = vadd.f32 %v2029_v52, %v1099_v11  ;;  %v1175_v35 = vadd.f32 %v1171_v12, %v2087_v9 }
 0x63d   :  { %v1727_v36 = vpop.f32.mrf.mxu0  ;;  %v1738_v37 = vpop.f32.mrf.mxu1 }
 0x63e   :  { %1441 = vst [vmem:[%s2203_s6 + $0x28] sm:$0xff] %v1100_v14  ;;  %1790 = vtanh.f32 %v1175_v35 }
 0x64b   :  { %v1791_v38 = vpop.eup %1790 }
 0x64c   :  { %1748 = vmatmul.mubr.msk.f32.vlgmr.msra.gmra.mxu0 %vm220_vm1, %v1791_v38  ;;  %1759 = vmatmul.mubr.msk.f32.vlgmr.msra.gmra.mxu1 %vm220_vm1, %v1791_v38 }
 0x64d   :  { %1762 = vmatpush3.msra.mxu0 %v1964_v40  ;;  %1769 = vmatprep.mubr.msk.f32.mxu0 %vm1796_vm0, %v1795_v6 }
 0x64e   :  { %1763 = vmatprep.subr.mxu0 %v1795_v6 }
 0x64f   :  { %1764 = vmatpush3.msra.mxu0 %v1969_v41 }
 0x650   :  { %1765 = vmatprep.subr.mxu0 %v1795_v6 }
 0x651   :  { %1766 = vmatpush3.msra.mxu0 %v1977_v42 }
 0x652   :  { %1767 = vmatprep.subr.mxu0 %v1795_v6 }
 0x653   :  { %1768 = vmatpush3.msra.mxu0 %v1986_v43 }
 0x70c   :  { %v1246_v18 = vpop.f32.mrf.mxu0  ;;  %v1318_v39 = vpop.f32.mrf.mxu1 }
 0x70d   :  { %v1247_v44 = vadd.f32 %v2029_v52, %v1246_v18  ;;  %v1322_v40 = vadd.f32 %v2085_v8, %v1318_v39 }
 0x70e   :  { %v1749_v45 = vpop.f32.mrf.mxu0  ;;  %v1760_v46 = vpop.f32.mrf.mxu1 }
 0x70f   :  { %1444 = vst [vmem:[%s2203_s6 + $0x30] sm:$0xff] %v1247_v44  ;;  %1792 = vtanh.f32 %v1322_v40 }
 0x71c   :  { %v1793_v41 = vpop.eup %1792 }
 0x71d   :  { %1399 = vst.msk [vmem:[%s2204_s7] sm:$0xff] %vm220_vm1, %v1793_v41  ;;  %1770 = vmatmul.mubr.msk.f32.vlgmr.msra.gmra.mxu0 %vm220_vm1, %v1793_v41 }
 0x7dd   :  { %v1393_v6 = vpop.f32.mrf.mxu0 }
 0x7de   :  { %v1394_v42 = vadd.f32 %v2029_v52, %v1393_v6 }
 0x7df   :  { %v1771_v43 = vpop.f32.mrf.mxu0 }
 0x7e0   :  { %1447 = vst [vmem:[%s2203_s6 + $0x38] sm:$0xff] %v1394_v42 }

</bundles_post_ra>
